<compile_context>
chip_gen: v6e
topology: v6e:2x2x1
jax: 0.10.0
libtpu: 0.0.40
codegen_flags: <defaults>
</compile_context>

<pallas_src>
import functools

import jax
import jax.numpy as jnp
from jax.experimental import pallas as pl
from jax.experimental.pallas import tpu as pltpu


def _beam_pinn_kernel(n_hidden, num_input, matmul_dtype, precision,
                      x_ref, w_in_ref, b_in_ref, w_hid_ref, b_hid_ref,
                      w_out_ref, b_out_ref, out_ref):
    """Feature-major MLP: activations are [features, TB], TB on the lane axis.

    Weights keep the PyTorch [out, in] layout, so every layer is W @ h + b
    with b a [out, 1] column broadcast.
    """
    x = x_ref[...]                                           # [I, TB], f32
    w_in = w_in_ref[...]                                     # [H, I]

    # --- Input layer on the VPU (K = num_input is tiny; the MXU would be <2%
    # utilized and still pay a weight load + drain).  Broadcast multiply-adds:
    #   h_pre[:, t] = sum_j w_in[:, j] * x[j, t]
    acc = w_in[:, 0:1] * x[0:1, :]                           # [H, TB]
    for j in range(1, num_input):
        acc = acc + w_in[:, j:j + 1] * x[j:j + 1, :]
    h = jnp.tanh(acc + b_in_ref[...])                        # [H, TB]

    # --- Hidden layers on the MXU, statically unrolled (n_hidden is a
    # trace-time constant).  Precision / operand dtype chosen explicitly.
    for i in range(n_hidden):
        h = jnp.tanh(
            jnp.dot(w_hid_ref[i].astype(matmul_dtype), h.astype(matmul_dtype),
                    preferred_element_type=jnp.float32, precision=precision)
            + b_hid_ref[i])

    # --- Output layer (no activation); last MXU op so its weight load
    # overlaps the previous layer's drain.                    -> [O, TB]
    out_ref[...] = (
        jnp.dot(w_out_ref[...].astype(matmul_dtype), h.astype(matmul_dtype),
                preferred_element_type=jnp.float32, precision=precision)
        + b_out_ref[...])


def beam_pinn_forward(x, w_in, b_in, w_hid, b_hid, w_out, b_out, *,
                      tb=8192, matmul_dtype=jnp.float32):
    """x: [B, num_input] -> [B, num_output].

    Parameter layout (PyTorch convention, transposed activations):
      w_in : [H, I]     b_in : [H, 1]
      w_hid: [L-1,H,H]  b_hid: [L-1, H, 1]
      w_out: [O, H]     b_out: [O, 1]
    """
    assert tb % 128 == 0, "batch tile must be a multiple of the 128-lane width"
    B, num_input = x.shape
    num_output, H = w_out.shape
    n_hidden = int(w_hid.shape[0])

    # Batch tile: as large as `tb`, but capped so big batches still produce
    # ~>=8 grid steps (parallel axis shards across v7x's 2 TCs); floor 128.
    tb_cap = pl.cdiv(pl.cdiv(B, 8), 128) * 128
    TB = max(128, min(tb, tb_cap))
    B_pad = pl.cdiv(B, TB) * TB
    grid = (B_pad // TB,)

    # Feature-major input; explicit zero padding on the batch axis (padded
    # columns flow through tanh + output layer and are sliced off below).
    x_t = jnp.pad(x.T.astype(jnp.float32), ((0, 0), (0, B_pad - B)))

    if n_hidden == 0:
        # Dummy operands; the unrolled loop has trip count 0, never read.
        w_hid = jnp.zeros((1, H, H), dtype=jnp.float32)
        b_hid = jnp.zeros((1, H, 1), dtype=jnp.float32)
    n_hid_blk = int(w_hid.shape[0])

    # Explicit numerics: true-f32 MXU matmuls by default (PINN 4th-derivative
    # losses), or an intentional bf16 cast when matmul_dtype=bfloat16.
    precision = (jax.lax.Precision.HIGHEST if matmul_dtype == jnp.float32
                 else jax.lax.Precision.DEFAULT)

    # Weights/biases: full-array blocks pinned to block 0 -> VMEM-resident
    # across every grid step (no per-step re-DMA).
    def rep2(shape):
        return pl.BlockSpec(shape, lambda i: (0, 0))

    def rep3(shape):
        return pl.BlockSpec(shape, lambda i: (0, 0, 0))

    weight_bytes = 4 * (w_in.size + b_in.size + w_hid.size + b_hid.size
                        + w_out.size + b_out.size)
    flops = 2 * B_pad * H * (num_input + n_hidden * H + num_output)
    transcendentals = B_pad * H * (n_hidden + 1)
    bytes_accessed = 4 * B_pad * (num_input + num_output) + weight_bytes

    # VMEM budget from the actual footprint (sublane-padded to 8) with
    # generous headroom, capped at 32 MiB (v7x physical VMEM is only 64 MiB).
    def pad8(n):
        return pl.cdiv(n, 8) * 8
    vmem_est = 4 * (2 * pad8(num_input) * TB        # x tiles (double-buffered)
                    + 2 * pad8(num_output) * TB     # out tiles (double-buffered)
                    + 6 * pad8(H) * TB)             # activations + elementwise temps
    vmem_est += 2 * weight_bytes + (2 << 20)
    vmem_limit = int(min(32 << 20, max(8 << 20, 2 * vmem_est)))

    out_t = pl.pallas_call(
        functools.partial(_beam_pinn_kernel, n_hidden, num_input,
                          matmul_dtype, precision),
        out_shape=jax.ShapeDtypeStruct((num_output, B_pad), jnp.float32),
        grid=grid,
        in_specs=[
            pl.BlockSpec((num_input, TB), lambda i: (0, i)),   # x tile
            rep2((H, num_input)),                              # w_in
            rep2((H, 1)),                                      # b_in
            rep3((n_hid_blk, H, H)),                           # w_hid (stacked)
            rep3((n_hid_blk, H, 1)),                           # b_hid (stacked)
            rep2((num_output, H)),                             # w_out
            rep2((num_output, 1)),                             # b_out
        ],
        out_specs=pl.BlockSpec((num_output, TB), lambda i: (0, i)),
        compiler_params=pltpu.CompilerParams(
            dimension_semantics=("parallel",),
            vmem_limit_bytes=vmem_limit),
        cost_estimate=pl.CostEstimate(
            flops=flops,
            transcendentals=transcendentals,
            bytes_accessed=bytes_accessed),
    )(x_t, w_in, b_in, w_hid, b_hid, w_out, b_out)

    return out_t[:, :B].T


def init_beam_pinn_params(key, num_input, num_output, num_neurons, num_layers):
    """Xavier-normal weights (gain=1.0), zero biases — matches the PyTorch init.

    Weights keep PyTorch's [out, in] shape; biases are [out, 1] columns.
    """
    def xavier_normal(k, fan_out, fan_in):
        std = (2.0 / (fan_in + fan_out)) ** 0.5
        return std * jax.random.normal(k, (fan_out, fan_in), dtype=jnp.float32)

    keys = jax.random.split(key, num_layers + 1)

    w_in = xavier_normal(keys[0], num_neurons, num_input)            # [H, I]
    b_in = jnp.zeros((num_neurons, 1), dtype=jnp.float32)            # [H, 1]

    n_hid = num_layers - 1
    if n_hid > 0:
        w_hid = jnp.stack(
            [xavier_normal(keys[1 + i], num_neurons, num_neurons)
             for i in range(n_hid)], axis=0)                         # [L-1,H,H]
    else:
        w_hid = jnp.zeros((0, num_neurons, num_neurons), dtype=jnp.float32)
    b_hid = jnp.zeros((max(n_hid, 0), num_neurons, 1), dtype=jnp.float32)

    w_out = xavier_normal(keys[num_layers], num_output, num_neurons)  # [O, H]
    b_out = jnp.zeros((num_output, 1), dtype=jnp.float32)             # [O, 1]

    return w_in, b_in, w_hid, b_hid, w_out, b_out


def reference_forward(x, w_in, b_in, w_hid, b_hid, w_out, b_out):
    """Pure-JAX reference, PyTorch semantics: y = x @ W.T + b (true-f32)."""
    hp = jax.lax.Precision.HIGHEST
    h = jnp.tanh(jnp.dot(x, w_in.T, precision=hp) + b_in[:, 0])
    for i in range(w_hid.shape[0]):
        h = jnp.tanh(jnp.dot(h, w_hid[i].T, precision=hp) + b_hid[i, :, 0])
    return jnp.dot(h, w_out.T, precision=hp) + b_out[:, 0]


if __name__ == "__main__":
    # BeamPINN-shaped problem: 2 inputs (x, load), 1 output (deflection),
    # 32 neurons, 3 layers (=> 2 hidden Linear+Tanh blocks).
    num_input, num_output, num_neurons, num_layers = 2, 1, 32, 3

    key = jax.random.PRNGKey(0)
    k_params, k_x1, k_x2 = jax.random.split(key, 3)

    params = init_beam_pinn_params(k_params, num_input, num_output,
                                   num_neurons, num_layers)

    # Small toy batch (single tile, TB floored to 128).
    x_small = jax.random.normal(k_x1, (8, num_input), dtype=jnp.float32)
    y_small = jax.block_until_ready(beam_pinn_forward(x_small, *params))
    y_small_ref = reference_forward(x_small, *params)
    assert y_small.shape == (8, num_output), y_small.shape
    assert jnp.allclose(y_small, y_small_ref, atol=1e-5, rtol=1e-4), \
        "mismatch vs reference (small batch)"

    # Ragged batch exercising the grid (3 tiles of 128) and batch padding.
    x_big = jax.random.normal(k_x2, (300, num_input), dtype=jnp.float32)
    y_big = jax.block_until_ready(beam_pinn_forward(x_big, *params))
    y_big_ref = reference_forward(x_big, *params)
    assert y_big.shape == (300, num_output), y_big.shape
    assert jnp.allclose(y_big, y_big_ref, atol=1e-5, rtol=1e-4), \
        "mismatch vs reference (tiled batch)"

    # Accuracy-gated bf16 fast path (v6e/v7x): looser tolerance by design.
    y_bf16 = jax.block_until_ready(
        beam_pinn_forward(x_big, *params, matmul_dtype=jnp.bfloat16))
    assert jnp.allclose(y_bf16, y_big_ref, atol=5e-2, rtol=5e-2), \
        "mismatch vs reference (bf16 matmul path)"

    print("KERNEL_OK")
</pallas_src>

<mosaic_0001>
module attributes {stable_mosaic.version = 11 : i64} {
  func.func @_beam_pinn_kernel(%arg0: i32, %arg1: memref<2x128xf32, #tpu.memory_space<vmem>>, %arg2: memref<32x2xf32, #tpu.memory_space<vmem>>, %arg3: memref<32x1xf32, #tpu.memory_space<vmem>>, %arg4: memref<2x32x32xf32, #tpu.memory_space<vmem>>, %arg5: memref<2x32x1xf32, #tpu.memory_space<vmem>>, %arg6: memref<1x32xf32, #tpu.memory_space<vmem>>, %arg7: memref<1x1xf32, #tpu.memory_space<vmem>>, %arg8: memref<1x128xf32, #tpu.memory_space<vmem>>) attributes {dimension_semantics = [#tpu.dimension_semantics<parallel>], iteration_bounds = array<i64: 1>, scalar_prefetch = 0 : i64, scratch_operands = 0 : i64, tpu.core_type = #tpu.core_type<tc>, window_params = [{transform_indices = @transform_0, window_bounds = array<i64: 2, 128>}, {pipeline_mode = #tpu.pipeline_mode<synchronous>, transform_indices = @transform_1, window_bounds = array<i64: 32, 2>}, {pipeline_mode = #tpu.pipeline_mode<synchronous>, transform_indices = @transform_2, window_bounds = array<i64: 32, 1>}, {pipeline_mode = #tpu.pipeline_mode<synchronous>, transform_indices = @transform_3, window_bounds = array<i64: 2, 32, 32>}, {pipeline_mode = #tpu.pipeline_mode<synchronous>, transform_indices = @transform_4, window_bounds = array<i64: 2, 32, 1>}, {pipeline_mode = #tpu.pipeline_mode<synchronous>, transform_indices = @transform_5, window_bounds = array<i64: 1, 32>}, {pipeline_mode = #tpu.pipeline_mode<synchronous>, transform_indices = @transform_6, window_bounds = array<i64: 1, 1>}, {transform_indices = @transform_7, window_bounds = array<i64: 1, 128>}]} {
    %c0 = arith.constant 0 : index
    %c0_0 = arith.constant 0 : index
    %0 = vector.load %arg1[%c0, %c0_0] : memref<2x128xf32, #tpu.memory_space<vmem>>, vector<2x128xf32>
    %c0_1 = arith.constant 0 : index
    %c0_2 = arith.constant 0 : index
    %1 = vector.load %arg2[%c0_1, %c0_2] : memref<32x2xf32, #tpu.memory_space<vmem>>, vector<32x2xf32>
    %2 = vector.extract_strided_slice %1 {offsets = [0, 0], sizes = [32, 1], strides = [1, 1]} : vector<32x2xf32> to vector<32x1xf32>
    %3 = vector.extract_strided_slice %0 {offsets = [0, 0], sizes = [1, 128], strides = [1, 1]} : vector<2x128xf32> to vector<1x128xf32>
    %4 = vector.broadcast %2 : vector<32x1xf32> to vector<32x128xf32>
    %5 = vector.broadcast %3 : vector<1x128xf32> to vector<32x128xf32>
    %6 = arith.mulf %4, %5 : vector<32x128xf32>
    %7 = vector.extract_strided_slice %1 {offsets = [0, 1], sizes = [32, 1], strides = [1, 1]} : vector<32x2xf32> to vector<32x1xf32>
    %8 = vector.extract_strided_slice %0 {offsets = [1, 0], sizes = [1, 128], strides = [1, 1]} : vector<2x128xf32> to vector<1x128xf32>
    %9 = vector.broadcast %7 : vector<32x1xf32> to vector<32x128xf32>
    %10 = vector.broadcast %8 : vector<1x128xf32> to vector<32x128xf32>
    %11 = arith.mulf %9, %10 : vector<32x128xf32>
    %12 = arith.addf %6, %11 : vector<32x128xf32>
    %c0_3 = arith.constant 0 : index
    %c0_4 = arith.constant 0 : index
    %13 = vector.load %arg3[%c0_3, %c0_4] : memref<32x1xf32, #tpu.memory_space<vmem>>, vector<32x1xf32>
    %14 = vector.broadcast %13 : vector<32x1xf32> to vector<32x128xf32>
    %15 = arith.addf %12, %14 : vector<32x128xf32>
    %16 = math.tanh %15 : vector<32x128xf32>
    %c0_5 = arith.constant 0 : index
    %c0_6 = arith.constant 0 : index
    %c0_7 = arith.constant 0 : index
    %17 = vector.load %arg4[%c0_5, %c0_6, %c0_7] : memref<2x32x32xf32, #tpu.memory_space<vmem>>, vector<1x32x32xf32>
    %18 = vector.shape_cast %17 : vector<1x32x32xf32> to vector<32x32xf32>
    %cst = arith.constant dense<0.000000e+00> : vector<32x128xf32>
    %19 = tpu.matmul %18, %16, %cst {dimension_numbers = #tpu.dot_dimension_numbers<[1], [0], [0], [1], [0, 0, 1, 1], [], []>, precision = #tpu.contract_precision<fp32>} : vector<32x32xf32>, vector<32x128xf32>, vector<32x128xf32> -> vector<32x128xf32>
    %c0_8 = arith.constant 0 : index
    %c0_9 = arith.constant 0 : index
    %c0_10 = arith.constant 0 : index
    %20 = vector.load %arg5[%c0_8, %c0_9, %c0_10] : memref<2x32x1xf32, #tpu.memory_space<vmem>>, vector<1x32x1xf32>
    %21 = vector.shape_cast %20 : vector<1x32x1xf32> to vector<32x1xf32>
    %22 = vector.broadcast %21 : vector<32x1xf32> to vector<32x128xf32>
    %23 = arith.addf %19, %22 : vector<32x128xf32>
    %24 = math.tanh %23 : vector<32x128xf32>
    %c1 = arith.constant 1 : index
    %c0_11 = arith.constant 0 : index
    %c0_12 = arith.constant 0 : index
    %25 = vector.load %arg4[%c1, %c0_11, %c0_12] : memref<2x32x32xf32, #tpu.memory_space<vmem>>, vector<1x32x32xf32>
    %26 = vector.shape_cast %25 : vector<1x32x32xf32> to vector<32x32xf32>
    %cst_13 = arith.constant dense<0.000000e+00> : vector<32x128xf32>
    %27 = tpu.matmul %26, %24, %cst_13 {dimension_numbers = #tpu.dot_dimension_numbers<[1], [0], [0], [1], [0, 0, 1, 1], [], []>, precision = #tpu.contract_precision<fp32>} : vector<32x32xf32>, vector<32x128xf32>, vector<32x128xf32> -> vector<32x128xf32>
    %c1_14 = arith.constant 1 : index
    %c0_15 = arith.constant 0 : index
    %c0_16 = arith.constant 0 : index
    %28 = vector.load %arg5[%c1_14, %c0_15, %c0_16] : memref<2x32x1xf32, #tpu.memory_space<vmem>>, vector<1x32x1xf32>
    %29 = vector.shape_cast %28 : vector<1x32x1xf32> to vector<32x1xf32>
    %30 = vector.broadcast %29 : vector<32x1xf32> to vector<32x128xf32>
    %31 = arith.addf %27, %30 : vector<32x128xf32>
    %32 = math.tanh %31 : vector<32x128xf32>
    %c0_17 = arith.constant 0 : index
    %c0_18 = arith.constant 0 : index
    %33 = vector.load %arg6[%c0_17, %c0_18] : memref<1x32xf32, #tpu.memory_space<vmem>>, vector<1x32xf32>
    %cst_19 = arith.constant dense<0.000000e+00> : vector<1x128xf32>
    %34 = tpu.matmul %33, %32, %cst_19 {dimension_numbers = #tpu.dot_dimension_numbers<[1], [0], [0], [1], [0, 0, 1, 1], [], []>, precision = #tpu.contract_precision<fp32>} : vector<1x32xf32>, vector<32x128xf32>, vector<1x128xf32> -> vector<1x128xf32>
    %c0_20 = arith.constant 0 : index
    %c0_21 = arith.constant 0 : index
    %35 = vector.load %arg7[%c0_20, %c0_21] : memref<1x1xf32, #tpu.memory_space<vmem>>, vector<1x1xf32>
    %36 = vector.broadcast %35 : vector<1x1xf32> to vector<1x128xf32>
    %37 = arith.addf %34, %36 : vector<1x128xf32>
    %c0_22 = arith.constant 0 : index
    %c0_23 = arith.constant 0 : index
    %38 = vector.load %arg8[%c0_22, %c0_23] : memref<1x128xf32, #tpu.memory_space<vmem>>, vector<1x128xf32>
    tpu.vector_store %arg8[%c0_22, %c0_23], %37 {strides = array<i32>} : memref<1x128xf32, #tpu.memory_space<vmem>>, vector<1x128xf32>,
    return
  }
  func.func @transform_0(%arg0: i32) -> (i32, i32) {
    %c0_i32 = arith.constant 0 : i32
    %c0_i32_0 = arith.constant 0 : i32
    return %c0_i32, %arg0 : i32, i32
  }
  func.func @transform_1(%arg0: i32) -> (i32, i32) {
    %c0_i32 = arith.constant 0 : i32
    %c0_i32_0 = arith.constant 0 : i32
    %c0_i32_1 = arith.constant 0 : i32
    return %c0_i32, %c0_i32_0 : i32, i32
  }
  func.func @transform_2(%arg0: i32) -> (i32, i32) {
    %c0_i32 = arith.constant 0 : i32
    %c0_i32_0 = arith.constant 0 : i32
    %c0_i32_1 = arith.constant 0 : i32
    return %c0_i32, %c0_i32_0 : i32, i32
  }
  func.func @transform_3(%arg0: i32) -> (i32, i32, i32) {
    %c0_i32 = arith.constant 0 : i32
    %c0_i32_0 = arith.constant 0 : i32
    %c0_i32_1 = arith.constant 0 : i32
    %c0_i32_2 = arith.constant 0 : i32
    return %c0_i32, %c0_i32_0, %c0_i32_1 : i32, i32, i32
  }
  func.func @transform_4(%arg0: i32) -> (i32, i32, i32) {
    %c0_i32 = arith.constant 0 : i32
    %c0_i32_0 = arith.constant 0 : i32
    %c0_i32_1 = arith.constant 0 : i32
    %c0_i32_2 = arith.constant 0 : i32
    return %c0_i32, %c0_i32_0, %c0_i32_1 : i32, i32, i32
  }
  func.func @transform_5(%arg0: i32) -> (i32, i32) {
    %c0_i32 = arith.constant 0 : i32
    %c0_i32_0 = arith.constant 0 : i32
    %c0_i32_1 = arith.constant 0 : i32
    return %c0_i32, %c0_i32_0 : i32, i32
  }
  func.func @transform_6(%arg0: i32) -> (i32, i32) {
    %c0_i32 = arith.constant 0 : i32
    %c0_i32_0 = arith.constant 0 : i32
    %c0_i32_1 = arith.constant 0 : i32
    return %c0_i32, %c0_i32_0 : i32, i32
  }
  func.func @transform_7(%arg0: i32) -> (i32, i32) {
    %c0_i32 = arith.constant 0 : i32
    %c0_i32_0 = arith.constant 0 : i32
    return %c0_i32, %arg0 : i32, i32
  }
}

</mosaic_0001>

<bundles_post_ra>
// kernel: tpu_custom_call.1
= control target key start
LH: loop header
LB: loop body
LE: loop exit
PB: predicated region body
PF: predicated region fallthrough
CT: control target
= control target key end

     0   :  { %s2794_s0 = inlined_call_operand.vmem [shape: f32[2,128], index: 0, kind: input, shape index: {}]   ;;  %s2795_s1 = inlined_call_operand.vmem [shape: f32[32,2], index: 1, kind: input, shape index: {}]   ;;  %s2796_s2 = inlined_call_operand.vmem [shape: f32[32,1], index: 2, kind: input, shape index: {}]   ;;  %s2797_s3 = inlined_call_operand.vmem [shape: f32[2,32,32], index: 3, kind: input, shape index: {}]   ;;  %s2798_s4 = inlined_call_operand.vmem [shape: f32[2,32,1], index: 4, kind: input, shape index: {}]   ;;  %s2799_s5 = inlined_call_operand.vmem [shape: f32[1,32], index: 5, kind: input, shape index: {}]   ;;  %s2800_s6 = inlined_call_operand.<no memory space> [shape: f32[1,1], index: 6, kind: input, shape index: {}]   ;;  %s2801_s7 = inlined_call_operand.hbm [shape: f32[1,128], index: 7, kind: output, shape index: {}]  }
   0x1   :  { %v12_v0 = vstv %s2800_s6 }
   0x2   :  { %13 = vst [vmem:[#allocation2] sm:$0x1] %v12_v0 }
   0x3   :  { %v33_v1 = vld [vmem:[%s2795_s1 + $0x18] sm:$0xff]  ;;  %v32_v2 = vld [vmem:[%s2795_s1 + $0x10] sm:$0xff]  ;;  %v2381_v3 = vmov 1   ;;  %v2382_v4 = vmov 0   ;;  %v31_v5 = vld [vmem:[%s2795_s1 + $0x8] sm:$0xff] }
   0x4   :  { %2328 = vset.pattern.permute.xlu0 %v2381_v3  ;;  %2329 = vset.pattern.permute.xlu1 %v2382_v4 }
   0x5   :  { %75 = vperm.xlu0 %2328, %v33_v1   ;;  %46 = vperm.xlu1 %2329, %v32_v2  }
   0x9   :  { %2330 = vset.pattern.permute.xlu1 %v2381_v3  ;;  %67 = vperm.xlu0 %2328, %v31_v5  }
   0xa   :  { %14 = vsyncpa [#allocation4], 0  ;;  %71 = vperm.xlu1 %2330, %v32_v2   ;;  %v30_v6 = vld [vmem:[%s2795_s1] sm:$0xff]  ;;  %v93_v7 = vld [vmem:[%s2796_s2 + $0x18] sm:$0xff]  ;;  %vm150_vm0 = vcmask 261120   ;;  %v54_v27 = vlaneseq  ;;  %vm2384_vm1 = vmmov 0  }
   0xb   :  { %v91_v8 = vld [vmem:[%s2796_s2 + $0x8] sm:$0xff]  ;;  %v129_v9 = vld [vmem:[%s2798_s4 + $0x18] sm:$0xff]  ;;  %v92_v10 = vld [vmem:[%s2796_s2 + $0x10] sm:$0xff] }
   0xc   :  { %v127_v11 = vld [vmem:[%s2798_s4 + $0x8] sm:$0xff]  ;;  %v90_v12 = vld [vmem:[%s2796_s2] sm:$0xff]  ;;  %v1962_v13 = vld [vmem:[%s2798_s4 + $0x38] sm:$0xff]  ;;  %v2491_v28 = vshrl.u32 %v54_v27, 7 }
   0xd   :  { %2332 = vset.pattern.permute.xlu0 %v2382_v4  ;;  %v128_v14 = vld [vmem:[%s2798_s4 + $0x10] sm:$0xff]  ;;  %v1960_v15 = vld [vmem:[%s2798_s4 + $0x28] sm:$0xff]  ;;  %v122_v16 = vld [vmem:[%s2797_s3] sm:$0xff] }
   0xe   :  { %2331 = vset.pattern.permute.xlu1 %v2382_v4  ;;  %51 = vperm.xlu0 %2332, %v33_v1   ;;  %v152_v17 = vsel %vm150_vm0, %v122_v16, 0  ;;  %v126_v18 = vld [vmem:[%s2798_s4] sm:$0xff]  ;;  %v1961_v22 = vld [vmem:[%s2798_s4 + $0x30] sm:$0xff]  ;;  %v80_v31 = vsub.s32 1, %v2491_v28  ;;  %v56_v32 = vsub.s32 0, %v2491_v28  ;;  %v123_v57 = vld [vmem:[%s2797_s3 + $0x8] sm:$0xff] }
   0xf   :  { %41 = vperm.xlu1 %2331, %v31_v5   ;;  %v2475_v19 = vand.u32 4294901760, %v152_v17  ;;  %v1442_v20 = vld [vmem:[#allocation2] sm:$0x1]  ;;  %v124_v59 = vld [vmem:[%s2797_s3 + $0x10] sm:$0xff]  ;;  %v155_v61 = vsel %vm150_vm0, %v123_v57, 0  ;;  %v125_v0 = vld [vmem:[%s2797_s3 + $0x18] sm:$0xff] }
  0x10   :  { %v1959_v25 = vld [vmem:[%s2798_s4 + $0x20] sm:$0xff]  ;;  %v158_v63 = vsel %vm150_vm0, %v124_v59, 0 }
  0x11   :  { %v2478_v21 = vsub.f32 %v152_v17, %v2475_v19  ;;  %2111 = vmatprep.mubr.f32.mxu1 %v2475_v19  ;;  %v29_v34 = vld [vmem:[%s2794_s0] sm:$0x3]  ;;  %v2513_v5 = vand.u32 4294901760, %v158_v63 }
  0x12   :  { %36 = vperm.xlu0 %2332, %v30_v6   ;;  %v81_v36 = vrot.slane %v29_v34, %v80_v31  ;;  %v57_v37 = vrot.slane %v29_v34, %v56_v32 }
  0x13   :  { %111 = vperm.xlu1 %2331, %v93_v7   ;;  %v234_v23 = vand.u32 4294901760, %v2478_v21 }
  0x15   :  { %v235_v24 = vsub.f32 %v2478_v21, %v234_v23 }
  0x16   :  { %101 = vperm.xlu0 %2332, %v91_v8  }
  0x17   :  { %2333 = vset.pattern.permute.xlu1 %v2381_v3  ;;  %v236_v26 = vand.u32 4294901760, %v235_v24  ;;  %v2511_v3 = vand.u32 4294901760, %v155_v61 }
  0x18   :  { %63 = vperm.xlu1 %2333, %v30_v6   ;;  %v161_v6 = vsel %vm150_vm0, %v125_v0, 0 }
  0x19   :  { %2097 = vmatprep.mubr.f32.mxu0 %v236_v26 }
  0x1a   :  { %147 = vperm.xlu0 %2332, %v129_v9  }
  0x1c   :  { %2334 = vset.pattern.permute.xlu1 %v2382_v4 }
  0x1d   :  { %106 = vperm.xlu1 %2334, %v92_v10   ;;  %v2521_v10 = vsub.f32 %v155_v61, %v2511_v3 }
  0x1e   :  { %137 = vperm.xlu0 %2332, %v127_v11   ;;  %v2523_v11 = vand.u32 4294901760, %v161_v6 }
  0x1f   :  { %v244_v16 = vand.u32 4294901760, %v2521_v10 }
  0x20   :  { %v2533_v17 = vsub.f32 %v161_v6, %v2523_v11 }
  0x21   :  { %96 = vperm.xlu1 %2334, %v90_v12   ;;  %v2527_v12 = vsub.f32 %v158_v63, %v2513_v5  ;;  %v245_v26 = vsub.f32 %v2521_v10, %v244_v16 }
  0x22   :  { %808 = vperm.xlu0 %2332, %v1962_v13   ;;  %v264_v27 = vand.u32 4294901760, %v2533_v17 }
  0x25   :  { %142 = vperm.xlu1 %2334, %v128_v14  }
  0x26   :  { %798 = vperm.xlu0 %2332, %v1960_v15  }
  0x29   :  { %132 = vperm.xlu1 %2334, %v126_v18   ;;  %v254_v18 = vand.u32 4294901760, %v2527_v12 }
  0x2a   :  { %1445 = vperm.xlu0 %2332, %v1442_v20  }
  0x2d   :  { %803 = vperm.xlu1 %2334, %v1961_v22  }
  0x31   :  { %793 = vperm.xlu1 %2334, %v1959_v25  }
  0x80   :  { %v47_v29 = vpop.permute.xlu1 %46  ;;  %v76_v30 = vpop.permute.xlu0 %75 }
  0x81   :  { %v85_v38 = vmul.f32 %v81_v36, %v76_v30  ;;  %v60_v53 = vmul.f32 %v57_v37, %v47_v29  ;;  %v255_v29 = vsub.f32 %v2527_v12, %v254_v18 }
  0x84   :  { %v68_v33 = vpop.permute.xlu0 %67 }
  0x85   :  { %v72_v35 = vpop.permute.xlu1 %71  ;;  %v83_v42 = vmul.f32 %v81_v36, %v68_v33 }
  0x86   :  { %v84_v51 = vmul.f32 %v81_v36, %v72_v35  ;;  %v246_v35 = vand.u32 4294901760, %v245_v26 }
  0x88   :  { %v88_v56 = vadd.f32 %v84_v51, %v60_v53 }
  0x89   :  { %v52_v39 = vpop.permute.xlu0 %51 }
  0x8a   :  { %v61_v40 = vmul.f32 %v57_v37, %v52_v39  ;;  %v42_v41 = vpop.permute.xlu1 %41 }
  0x8b   :  { %v59_v43 = vmul.f32 %v57_v37, %v42_v41 }
  0x8c   :  { %v89_v44 = vadd.f32 %v85_v38, %v61_v40  ;;  %v256_v38 = vand.u32 4294901760, %v255_v29 }
  0x8d   :  { %v37_v45 = vpop.permute.xlu0 %36  ;;  %v87_v48 = vadd.f32 %v83_v42, %v59_v43 }
  0x8e   :  { %v112_v46 = vpop.permute.xlu1 %111  ;;  %v58_v54 = vmul.f32 %v57_v37, %v37_v45  ;;  %v265_v37 = vsub.f32 %v2533_v17, %v264_v27 }
  0x8f   :  { %v117_v47 = vadd.f32 %v112_v46, %v89_v44 }
  0x90   :  { %v266_v43 = vand.u32 4294901760, %v265_v37 }
  0x91   :  { %2335 = vtanh.f32 %v117_v47  ;;  %v102_v49 = vpop.permute.xlu0 %101 }
  0x92   :  { %v115_v50 = vadd.f32 %v102_v49, %v87_v48 }
  0x93   :  { %v64_v52 = vpop.permute.xlu1 %63 }
  0x94   :  { %2337 = vtanh.f32 %v115_v50  ;;  %v82_v55 = vmul.f32 %v81_v36, %v64_v52 }
  0x95   :  { %v148_v57 = vpop.permute.xlu0 %147 }
  0x96   :  { %v86_v62 = vadd.f32 %v82_v55, %v58_v54 }
  0x98   :  { %v107_v58 = vpop.permute.xlu1 %106 }
  0x99   :  { %v116_v60 = vadd.f32 %v107_v58, %v88_v56  ;;  %v138_v63 = vpop.permute.xlu0 %137 }
  0x9b   :  { %2339 = vtanh.f32 %v116_v60 }
  0x9c   :  { %v97_v1 = vpop.permute.xlu1 %96 }
  0x9d   :  { %v114_v2 = vadd.f32 %v97_v1, %v86_v62 }
  0x9e   :  { %v2336_v4 = vpop.eup %2335 }
  0x9f   :  { %v2516_v7 = vand.u32 4294901760, %v2336_v4  ;;  %2341 = vtanh.f32 %v114_v2 }
  0xa0   :  { %v143_v60 = vpop.permute.xlu1 %142 }
  0xa1   :  { %v2338_v8 = vpop.eup %2337  ;;  %2089 = vmatprep.subr.mxu0 %v2516_v7  ;;  %v298_v9 = vsub.f32 %v2336_v4, %v2516_v7 }
  0xa2   :  { %2090 = vmatpush3.msra.mxu0 %v2516_v7  ;;  %v2529_v13 = vand.u32 4294901760, %v2338_v8 }
  0xa3   :  { %v299_v14 = vand.u32 4294901760, %v298_v9 }
  0xa4   :  { %v312_v22 = vsub.f32 %v2338_v8, %v2529_v13  ;;  %v133_v2 = vpop.permute.xlu1 %132 }
  0xa5   :  { %v300_v15 = vsub.f32 %v298_v9, %v299_v14 }
  0xa6   :  { %v313_v31 = vand.u32 4294901760, %v312_v22 }
  0xa7   :  { %v301_v20 = vand.u32 4294901760, %v300_v15 }
  0xa8   :  { %v2340_v24 = vpop.eup %2339  ;;  %v314_v40 = vsub.f32 %v312_v22, %v313_v31 }
  0xa9   :  { %v2537_v25 = vand.u32 4294901760, %v2340_v24  ;;  %2103 = vmatprep.subr.mxu1 %v301_v20 }
  0xaa   :  { %2104 = vmatpush3.msra.mxu1 %v301_v20  ;;  %v315_v45 = vand.u32 4294901760, %v314_v40 }
  0xab   :  { %2091 = vmatprep.subr.mxu0 %v2537_v25  ;;  %v305_v30 = vsub.f32 %v2340_v24, %v2537_v25 }
  0xac   :  { %v2342_v33 = vpop.eup %2341  ;;  %2092 = vmatpush3.msra.mxu0 %v2537_v25 }
  0xad   :  { %v2549_v34 = vand.u32 4294901760, %v2342_v33  ;;  %2093 = vmatprep.subr.mxu0 %v2529_v13  ;;  %v306_v36 = vand.u32 4294901760, %v305_v30 }
  0xae   :  { %2094 = vmatpush3.msra.mxu0 %v2529_v13 }
  0xaf   :  { %2095 = vmatprep.subr.mxu0 %v2549_v34  ;;  %v307_v39 = vsub.f32 %v305_v30, %v306_v36  ;;  %v319_v41 = vsub.f32 %v2342_v33, %v2549_v34 }
  0xb0   :  { %2096 = vmatpush3.msra.mxu0 %v2549_v34 }
  0xb1   :  { %2098 = vmatmul.mubr.f32.vlgmr.msra.gmra.mxu0 %v246_v35  ;;  %2117 = vmatprep.subr.mxu0 %v298_v9  ;;  %v308_v42 = vand.u32 4294901760, %v307_v39  ;;  %v320_v44 = vand.u32 4294901760, %v319_v41 }
  0xb2   :  { %2118 = vmatpush3.msra.mxu0 %v298_v9  ;;  %2100 = vmatprep.mubr.f32.mxu0 %v256_v38 }
  0xb3   :  { %2105 = vmatprep.subr.mxu1 %v308_v42  ;;  %2119 = vmatprep.subr.mxu0 %v305_v30  ;;  %v321_v46 = vsub.f32 %v319_v41, %v320_v44 }
  0xb4   :  { %2106 = vmatpush3.msra.mxu1 %v308_v42  ;;  %2120 = vmatpush3.msra.mxu0 %v305_v30 }
  0xb5   :  { %2101 = vmatmul.mubr.f32.gmra.mxu0 %v266_v43  ;;  %2107 = vmatprep.subr.mxu1 %v315_v45  ;;  %v322_v47 = vand.u32 4294901760, %v321_v46  ;;  %v1956_v43 = vld [vmem:[%s2797_s3 + $0x28] sm:$0xff] }
  0xb6   :  { %2121 = vmatprep.subr.mxu0 %v312_v22  ;;  %2108 = vmatpush3.msra.mxu1 %v315_v45  ;;  %v815_v46 = vsel %vm150_vm0, %v1956_v43, 0 }
  0xb7   :  { %2122 = vmatpush3.msra.mxu0 %v312_v22  ;;  %2109 = vmatprep.subr.mxu1 %v322_v47 }
  0xb8   :  { %2123 = vmatprep.subr.mxu0 %v319_v41  ;;  %2110 = vmatpush3.msra.mxu1 %v322_v47  ;;  %v1957_v47 = vld [vmem:[%s2797_s3 + $0x30] sm:$0xff] }
  0xb9   :  { %2124 = vmatpush3.msra.mxu0 %v319_v41  ;;  %2112 = vmatmul.mubr.f32.vlgmr.msra.gmra.mxu1 %v2511_v3 }
  0xba   :  { %2125 = vmatprep.mubr.f32.mxu0 %v2478_v21  ;;  %2131 = vmatprep.subr.mxu1 %v2516_v7  ;;  %v1955_v21 = vld [vmem:[%s2797_s3 + $0x20] sm:$0xff] }
  0xbb   :  { %2145 = vmatprep.subr.mxu0 %v299_v14  ;;  %2126 = vmatmul.mubr.f32.vlgmr.msra.gmra.mxu0 %v2521_v10 }
  0xbc   :  { %2132 = vmatpush3.msra.mxu1 %v2516_v7  ;;  %2146 = vmatpush3.msra.mxu0 %v299_v14 }
  0xbd   :  { %2133 = vmatprep.subr.mxu1 %v2537_v25  ;;  %2147 = vmatprep.subr.mxu0 %v306_v36 }
  0xbe   :  { %2114 = vmatprep.mubr.f32.mxu1 %v2513_v5  ;;  %2134 = vmatpush3.msra.mxu1 %v2537_v25 }
  0xbf   :  { %2148 = vmatpush3.msra.mxu0 %v306_v36  ;;  %2115 = vmatmul.mubr.f32.gmra.mxu1 %v2523_v11 }
  0xc0   :  { %2135 = vmatprep.subr.mxu1 %v2529_v13  ;;  %2149 = vmatprep.subr.mxu0 %v313_v31 }
  0xc1   :  { %2128 = vmatprep.mubr.f32.mxu0 %v2527_v12  ;;  %2136 = vmatpush3.msra.mxu1 %v2529_v13 }
  0xc2   :  { %2150 = vmatpush3.msra.mxu0 %v313_v31  ;;  %2137 = vmatprep.subr.mxu1 %v2549_v34 }
  0xc3   :  { %2129 = vmatmul.mubr.f32.gmra.mxu0 %v2533_v17  ;;  %2151 = vmatprep.subr.mxu0 %v320_v44 }
  0xc4   :  { %2138 = vmatpush3.msra.mxu1 %v2549_v34  ;;  %2139 = vmatprep.mubr.f32.mxu1 %v234_v23  ;;  %v812_v23 = vsel %vm150_vm0, %v1955_v21, 0  ;;  %v1958_v21 = vld [vmem:[%s2797_s3 + $0x38] sm:$0xff] }
  0xc5   :  { %2152 = vmatpush3.msra.mxu0 %v320_v44  ;;  %2140 = vmatmul.mubr.f32.vlgmr.msra.gmra.mxu1 %v244_v16  ;;  %v2602_v48 = vand.u32 4294901760, %v812_v23 }
  0xc6   :  { %2159 = vmatprep.subr.mxu1 %v2516_v7  ;;  %2153 = vmatprep.mubr.f32.mxu0 %v2475_v19 }
  0xc7   :  { %2160 = vmatpush3.msra.mxu1 %v2516_v7  ;;  %2154 = vmatmul.mubr.f32.vlgmr.msra.gmra.mxu0 %v2511_v3  ;;  %v2605_v49 = vsub.f32 %v812_v23, %v2602_v48  ;;  %v2622_v23 = vand.u32 4294901760, %v815_v46 }
  0xc8   :  { %2161 = vmatprep.subr.mxu1 %v2537_v25  ;;  %2142 = vmatprep.mubr.f32.mxu1 %v254_v18 }
  0xc9   :  { %2162 = vmatpush3.msra.mxu1 %v2537_v25  ;;  %2156 = vmatprep.mubr.f32.mxu0 %v2513_v5 }
  0xca   :  { %2143 = vmatmul.mubr.f32.gmra.mxu1 %v264_v27  ;;  %2163 = vmatprep.subr.mxu1 %v2529_v13 }
  0xcb   :  { %2164 = vmatpush3.msra.mxu1 %v2529_v13  ;;  %2157 = vmatmul.mubr.f32.gmra.mxu0 %v2523_v11 }
  0xcc   :  { %2165 = vmatprep.subr.mxu1 %v2549_v34  ;;  %2167 = vmatprep.mubr.f32.mxu1 %v2475_v19  ;;  %v894_v19 = vand.u32 4294901760, %v2605_v49 }
  0xcd   :  { %2166 = vmatpush3.msra.mxu1 %v2549_v34 }
  0xce   :  { %2168 = vmatmul.mubr.f32.vlgmr.msra.gmra.mxu1 %v2511_v3  ;;  %v895_v50 = vsub.f32 %v2605_v49, %v894_v19 }
  0xcf   :  { %2170 = vmatprep.mubr.f32.mxu1 %v2513_v5 }
  0xd0   :  { %v896_v51 = vand.u32 4294901760, %v895_v50  ;;  %v818_v50 = vsel %vm150_vm0, %v1957_v47, 0 }
  0xd2   :  { %2171 = vmatmul.mubr.f32.gmra.mxu1 %v2523_v11  ;;  %2181 = vmatprep.mubr.f32.mxu0 %v896_v51  ;;  %v821_v51 = vsel %vm150_vm0, %v1958_v21, 0 }
  0xd3   :  { %2195 = vmatprep.mubr.f32.mxu1 %v2602_v48 }
 0x171   :  { %v2099_v52 = vpop.f32.mrf.mxu0 }
 0x172   :  { %v249_v0 = vadd.f32 %v2099_v52, %v138_v63  ;;  %v2626_v52 = vand.u32 4294901760, %v818_v50 }
 0x173   :  { %v238_v53 = vpop.f32.mrf.mxu0 }
 0x174   :  { %v239_v3 = vadd.f32 %v238_v53, %v133_v2  ;;  %v2629_v53 = vsub.f32 %v815_v46, %v2622_v23 }
 0x175   :  { %v2102_v54 = vpop.f32.mrf.mxu0 }
 0x176   :  { %v269_v6 = vadd.f32 %v2102_v54, %v148_v57 }
 0x177   :  { %v258_v55 = vpop.f32.mrf.mxu0 }
 0x178   :  { %v259_v10 = vadd.f32 %v258_v55, %v143_v60  ;;  %v2631_v55 = vand.u32 4294901760, %v821_v51 }
 0x179   :  { %v2113_v56 = vpop.f32.mrf.mxu1 }
 0x17a   :  { %v366_v4 = vadd.f32 %v2113_v56, %v249_v0 }
 0x17b   :  { %v359_v58 = vpop.f32.mrf.mxu1  ;;  %v2127_v59 = vpop.f32.mrf.mxu0 }
 0x17c   :  { %v360_v7 = vadd.f32 %v359_v58, %v239_v3  ;;  %v465_v11 = vadd.f32 %v2127_v59, %v366_v4  ;;  %v2636_v58 = vsub.f32 %v818_v50, %v2626_v52  ;;  %v904_v59 = vand.u32 4294901760, %v2629_v53 }
 0x17d   :  { %v457_v62 = vpop.f32.mrf.mxu0 }
 0x17e   :  { %v458_v15 = vadd.f32 %v457_v62, %v360_v7  ;;  %v2642_v62 = vsub.f32 %v821_v51, %v2631_v55  ;;  %v905_v4 = vsub.f32 %v2629_v53, %v904_v59 }
 0x17f   :  { %v2116_v61 = vpop.f32.mrf.mxu1 }
 0x180   :  { %v378_v12 = vadd.f32 %v2116_v61, %v269_v6  ;;  %v924_v6 = vand.u32 4294901760, %v2642_v62 }
 0x181   :  { %v371_v1 = vpop.f32.mrf.mxu1 }
 0x182   :  { %v372_v16 = vadd.f32 %v371_v1, %v259_v10  ;;  %v914_v1 = vand.u32 4294901760, %v2636_v58 }
 0x183   :  { %v2130_v5 = vpop.f32.mrf.mxu0 }
 0x184   :  { %v479_v22 = vadd.f32 %v2130_v5, %v378_v12  ;;  %v915_v10 = vsub.f32 %v2636_v58, %v914_v1  ;;  %v906_v12 = vand.u32 4294901760, %v905_v4 }
 0x185   :  { %v471_v8 = vpop.f32.mrf.mxu0  ;;  %v2141_v9 = vpop.f32.mrf.mxu1 }
 0x186   :  { %v564_v17 = vadd.f32 %v2141_v9, %v465_v11  ;;  %v472_v27 = vadd.f32 %v471_v8, %v372_v16 }
 0x187   :  { %v555_v13 = vpop.f32.mrf.mxu1  ;;  %v2155_v14 = vpop.f32.mrf.mxu0 }
 0x188   :  { %v556_v24 = vadd.f32 %v555_v13, %v458_v15  ;;  %v669_v29 = vadd.f32 %v2155_v14, %v564_v17  ;;  %v925_v15 = vsub.f32 %v2642_v62, %v924_v6 }
 0x189   :  { %v662_v18 = vpop.f32.mrf.mxu0 }
 0x18a   :  { %v2144_v20 = vpop.f32.mrf.mxu1  ;;  %v663_v33 = vadd.f32 %v662_v18, %v556_v24 }
 0x18b   :  { %v2158_v26 = vpop.f32.mrf.mxu0  ;;  %v580_v30 = vadd.f32 %v2144_v20, %v479_v22  ;;  %v916_v20 = vand.u32 4294901760, %v915_v10 }
 0x18c   :  { %v571_v25 = vpop.f32.mrf.mxu1 }
 0x18d   :  { %v572_v34 = vadd.f32 %v571_v25, %v472_v27  ;;  %v674_v36 = vpop.f32.mrf.mxu0  ;;  %v681_v38 = vadd.f32 %v2158_v26, %v580_v30  ;;  %v926_v25 = vand.u32 4294901760, %v925_v15 }
 0x18e   :  { %v2169_v31 = vpop.f32.mrf.mxu1 }
 0x18f   :  { %v762_v35 = vadd.f32 %v2169_v31, %v669_v29  ;;  %v675_v41 = vadd.f32 %v674_v36, %v572_v34  ;;  %v809_v34 = vpop.permute.xlu0 %808 }
 0x190   :  { %v755_v37 = vpop.f32.mrf.mxu1 }
 0x191   :  { %2343 = vtanh.f32 %v762_v35  ;;  %v756_v39 = vadd.f32 %v755_v37, %v663_v33  ;;  %v804_v37 = vpop.permute.xlu1 %803 }
 0x192   :  { %v2172_v40 = vpop.f32.mrf.mxu1 }
 0x193   :  { %2345 = vtanh.f32 %v756_v39  ;;  %v774_v42 = vadd.f32 %v2172_v40, %v681_v38  ;;  %v799_v40 = vpop.permute.xlu0 %798 }
 0x194   :  { %v767_v44 = vpop.f32.mrf.mxu1 }
 0x195   :  { %2347 = vtanh.f32 %v774_v42  ;;  %v768_v45 = vadd.f32 %v767_v44, %v675_v41  ;;  %v794_v43 = vpop.permute.xlu1 %793 }
 0x197   :  { %2349 = vtanh.f32 %v768_v45 }
 0x19e   :  { %v2344_v54 = vpop.eup %2343 }
 0x19f   :  { %v2633_v57 = vand.u32 4294901760, %v2344_v54 }
 0x1a0   :  { %v2346_v56 = vpop.eup %2345 }
 0x1a1   :  { %v2639_v61 = vand.u32 4294901760, %v2346_v56  ;;  %v972_v2 = vsub.f32 %v2344_v54, %v2633_v57 }
 0x1a2   :  { %v2348_v60 = vpop.eup %2347 }
 0x1a3   :  { %v2644_v63 = vand.u32 4294901760, %v2348_v60  ;;  %v979_v7 = vsub.f32 %v2346_v56, %v2639_v61  ;;  %v973_v11 = vand.u32 4294901760, %v972_v2 }
 0x1a4   :  { %v2350_v0 = vpop.eup %2349 }
 0x1a5   :  { %v2648_v3 = vand.u32 4294901760, %v2350_v0  ;;  %2173 = vmatprep.subr.mxu0 %v2644_v63  ;;  %v958_v5 = vsub.f32 %v2348_v60, %v2644_v63  ;;  %v980_v16 = vand.u32 4294901760, %v979_v7  ;;  %v974_v22 = vsub.f32 %v972_v2, %v973_v11 }
 0x1a6   :  { %2174 = vmatpush3.msra.mxu0 %v2644_v63 }
 0x1a7   :  { %2175 = vmatprep.subr.mxu0 %v2648_v3  ;;  %v959_v8 = vand.u32 4294901760, %v958_v5  ;;  %v965_v9 = vsub.f32 %v2350_v0, %v2648_v3  ;;  %v981_v26 = vsub.f32 %v979_v7, %v980_v16  ;;  %v975_v27 = vand.u32 4294901760, %v974_v22 }
 0x1a8   :  { %2176 = vmatpush3.msra.mxu0 %v2648_v3 }
 0x1a9   :  { %2177 = vmatprep.subr.mxu0 %v2633_v57  ;;  %v960_v13 = vsub.f32 %v958_v5, %v959_v8  ;;  %v966_v14 = vand.u32 4294901760, %v965_v9  ;;  %v982_v29 = vand.u32 4294901760, %v981_v26 }
 0x1aa   :  { %2178 = vmatpush3.msra.mxu0 %v2633_v57 }
 0x1ab   :  { %2179 = vmatprep.subr.mxu0 %v2639_v61  ;;  %v961_v17 = vand.u32 4294901760, %v960_v13  ;;  %v967_v18 = vsub.f32 %v965_v9, %v966_v14  ;;  %v1441_v13 = vld [vmem:[%s2799_s5] sm:$0x1]  ;;  %s2385_s5 = smov [#allocation3]  }
 0x1ac   :  { %2180 = vmatpush3.msra.mxu0 %v2639_v61  ;;  %s1947_s24 = sshll.u32 %s2385_s5, 4  ;;  %s1948_s24 = int_to_ptr.vmem [resolvable:$true] %s1947_s24 }
 0x1ad   :  { %2182 = vmatmul.mubr.f32.vlgmr.msra.gmra.mxu0 %v906_v12  ;;  %2187 = vmatprep.subr.mxu1 %v961_v17  ;;  %v968_v24 = vand.u32 4294901760, %v967_v18  ;;  %v1453_v18 = vsel %vm150_vm0, %v1441_v13, 0  ;;  %s2359_s25 = scalar_lea.vmem %s1948_s24, 16  ;;  %s2363_s26 = scalar_lea.vmem %s1948_s24, 32 }
 0x1ae   :  { %2201 = vmatprep.subr.mxu0 %v958_v5  ;;  %2188 = vmatpush3.msra.mxu1 %v961_v17  ;;  %p2360_p0 = scmp.ne.s32.totalorder %s1948_s24, %s2359_s25  ;;  %p2364_p1 = scmp.lt.s32.totalorder %s1948_s24, %s1948_s24 }
 0x1af   :  { %2202 = vmatpush3.msra.mxu0 %v958_v5  ;;  %2189 = vmatprep.subr.mxu1 %v968_v24  ;;  %p2365_p2 = scmp.lt.s32.totalorder %s2363_s26, %s2359_s25 }
 0x1b0   :  { %2203 = vmatprep.subr.mxu0 %v965_v9  ;;  %2184 = vmatprep.mubr.f32.mxu0 %v916_v20  ;;  %v2720_v20 = vand.u32 4294901760, %v1453_v18 }
 0x1b1   :  { %2190 = vmatpush3.msra.mxu1 %v968_v24  ;;  %2204 = vmatpush3.msra.mxu0 %v965_v9  ;;  %p2366_p3 = por %p2365_p2, %p2364_p1 }
 0x1b2   :  { %2185 = vmatmul.mubr.f32.gmra.mxu0 %v926_v25  ;;  %2191 = vmatprep.subr.mxu1 %v975_v27  ;;  %v2723_v22 = vsub.f32 %v1453_v18, %v2720_v20 }
 0x1b3   :  { %2205 = vmatprep.subr.mxu0 %v972_v2  ;;  %2192 = vmatpush3.msra.mxu1 %v975_v27  ;;  %p2367_p4 = pnand %p2366_p3, %p2360_p0 }
 0x1b4   :  { %2206 = vmatpush3.msra.mxu0 %v972_v2  ;;  %2193 = vmatprep.subr.mxu1 %v982_v29  ;;  %v1526_v27 = vand.u32 4294901760, %v2723_v22 }
 0x1b5   :  { %2207 = vmatprep.subr.mxu0 %v979_v7  ;;  %2194 = vmatpush3.msra.mxu1 %v982_v29 }
 0x1b6   :  { %2208 = vmatpush3.msra.mxu0 %v979_v7  ;;  %2196 = vmatmul.mubr.f32.vlgmr.msra.gmra.mxu1 %v2622_v23 }
 0x1b7   :  { %2209 = vmatprep.mubr.f32.mxu0 %v2605_v49  ;;  %2215 = vmatprep.subr.mxu1 %v2644_v63  ;;  %v2383_v49 = vmov 0.0  }
 0x1b8   :  { %2229 = vmatprep.subr.mxu0 %v959_v8  ;;  %2210 = vmatmul.mubr.f32.vlgmr.msra.gmra.mxu0 %v2629_v53 }
 0x1b9   :  { %2216 = vmatpush3.msra.mxu1 %v2644_v63  ;;  %2230 = vmatpush3.msra.mxu0 %v959_v8 }
 0x1ba   :  { %2217 = vmatprep.subr.mxu1 %v2648_v3  ;;  %2231 = vmatprep.subr.mxu0 %v966_v14 }
 0x1bb   :  { %2198 = vmatprep.mubr.f32.mxu1 %v2626_v52  ;;  %2218 = vmatpush3.msra.mxu1 %v2648_v3 }
 0x1bc   :  { %2232 = vmatpush3.msra.mxu0 %v966_v14  ;;  %2199 = vmatmul.mubr.f32.gmra.mxu1 %v2631_v55 }
 0x1bd   :  { %2219 = vmatprep.subr.mxu1 %v2633_v57  ;;  %2233 = vmatprep.subr.mxu0 %v973_v11 }
 0x1be   :  { %2212 = vmatprep.mubr.f32.mxu0 %v2636_v58  ;;  %2220 = vmatpush3.msra.mxu1 %v2633_v57 }
 0x1bf   :  { %2234 = vmatpush3.msra.mxu0 %v973_v11  ;;  %2221 = vmatprep.subr.mxu1 %v2639_v61 }
 0x1c0   :  { %2213 = vmatmul.mubr.f32.gmra.mxu0 %v2642_v62  ;;  %2235 = vmatprep.subr.mxu0 %v980_v16 }
 0x1c1   :  { %2222 = vmatpush3.msra.mxu1 %v2639_v61  ;;  %2223 = vmatprep.mubr.f32.mxu1 %v894_v19 }
 0x1c2   :  { %2236 = vmatpush3.msra.mxu0 %v980_v16  ;;  %2224 = vmatmul.mubr.f32.vlgmr.msra.gmra.mxu1 %v904_v59 }
 0x1c3   :  { %2243 = vmatprep.subr.mxu1 %v2644_v63  ;;  %2237 = vmatprep.mubr.f32.mxu0 %v2602_v48 }
 0x1c4   :  { %2244 = vmatpush3.msra.mxu1 %v2644_v63  ;;  %2238 = vmatmul.mubr.f32.vlgmr.msra.gmra.mxu0 %v2622_v23 }
 0x1c5   :  { %2245 = vmatprep.subr.mxu1 %v2648_v3  ;;  %2226 = vmatprep.mubr.f32.mxu1 %v914_v1 }
 0x1c6   :  { %2246 = vmatpush3.msra.mxu1 %v2648_v3  ;;  %2240 = vmatprep.mubr.f32.mxu0 %v2626_v52 }
 0x1c7   :  { %2227 = vmatmul.mubr.f32.gmra.mxu1 %v924_v6  ;;  %2247 = vmatprep.subr.mxu1 %v2633_v57 }
 0x1c8   :  { %2248 = vmatpush3.msra.mxu1 %v2633_v57  ;;  %2241 = vmatmul.mubr.f32.gmra.mxu0 %v2631_v55 }
 0x1c9   :  { %2249 = vmatprep.subr.mxu1 %v2639_v61  ;;  %2251 = vmatprep.mubr.f32.mxu1 %v2602_v48 }
 0x1ca   :  { %2250 = vmatpush3.msra.mxu1 %v2639_v61  ;;  %2257 = vmatprep.subr.mxu0 %v2383_v49 }
 0x1cb   :  { %2252 = vmatmul.mubr.f32.vlgmr.msra.gmra.mxu1 %v2622_v23  ;;  %2268 = vmatprep.subr.mxu1 %v2383_v49 }
 0x1cc   :  { %2254 = vmatprep.mubr.f32.mxu1 %v2626_v52  ;;  %2265 = vmatprep.mubr.msk.f32.mxu0 %vm2384_vm1, %v2383_v49 }
 0x1cf   :  { %2255 = vmatmul.mubr.f32.gmra.mxu1 %v2631_v55 }
 0x1d0   :  { %2276 = vmatprep.mubr.msk.f32.mxu1 %vm2384_vm1, %v2383_v49 }
 0x26d   :  { %v2183_v48 = vpop.f32.mrf.mxu0 }
 0x26e   :  { %v909_v41 = vadd.f32 %v2183_v48, %v799_v40 }
 0x26f   :  { %v898_v19 = vpop.f32.mrf.mxu0 }
 0x270   :  { %v899_v44 = vadd.f32 %v898_v19, %v794_v43 }
 0x272   :  { %v2186_v30 = vpop.f32.mrf.mxu0 }
 0x273   :  { %v929_v47 = vadd.f32 %v2186_v30, %v809_v34 }
 0x274   :  { %v918_v31 = vpop.f32.mrf.mxu0 }
 0x275   :  { %v919_v51 = vadd.f32 %v918_v31, %v804_v37 }
 0x276   :  { %v2197_v33 = vpop.f32.mrf.mxu1 }
 0x277   :  { %v1026_v45 = vadd.f32 %v2197_v33, %v909_v41  ;;  %v1527_v33 = vsub.f32 %v2723_v22, %v1526_v27 }
 0x278   :  { %v1019_v35 = vpop.f32.mrf.mxu1  ;;  %v2211_v36 = vpop.f32.mrf.mxu0 }
 0x279   :  { %v1020_v21 = vadd.f32 %v1019_v35, %v899_v44  ;;  %v1125_v52 = vadd.f32 %v2211_v36, %v1026_v45  ;;  %v1528_v40 = vand.u32 4294901760, %v1527_v33 }
 0x27a   :  { %v1117_v39 = vpop.f32.mrf.mxu0 }
 0x27b   :  { %v1118_v56 = vadd.f32 %v1117_v39, %v1020_v21 }
 0x27c   :  { %v2200_v38 = vpop.f32.mrf.mxu1 }
 0x27d   :  { %v1038_v53 = vadd.f32 %v2200_v38, %v929_v47 }
 0x27e   :  { %v1031_v42 = vpop.f32.mrf.mxu1 }
 0x27f   :  { %v1032_v57 = vadd.f32 %v1031_v42, %v919_v51 }
 0x280   :  { %v2214_v46 = vpop.f32.mrf.mxu0 }
 0x281   :  { %v1139_v61 = vadd.f32 %v2214_v46, %v1038_v53  ;;  %v1446_v53 = vpop.permute.xlu0 %1445 }
 0x282   :  { %v1131_v23 = vpop.f32.mrf.mxu0  ;;  %v2225_v50 = vpop.f32.mrf.mxu1 }
 0x283   :  { %v1224_v58 = vadd.f32 %v2225_v50, %v1125_v52  ;;  %v1132_v1 = vadd.f32 %v1131_v23, %v1032_v57  ;;  %v1451_v57 = vrot.slane %v1446_v53, %v56_v32 }
 0x284   :  { %v1215_v54 = vpop.f32.mrf.mxu1  ;;  %v2239_v55 = vpop.f32.mrf.mxu0 }
 0x285   :  { %v1216_v62 = vadd.f32 %v1215_v54, %v1118_v56  ;;  %v1329_v2 = vadd.f32 %v2239_v55, %v1224_v58 }
 0x286   :  { %v1322_v59 = vpop.f32.mrf.mxu0 }
 0x287   :  { %v2228_v60 = vpop.f32.mrf.mxu1  ;;  %v1323_v5 = vadd.f32 %v1322_v59, %v1216_v62 }
 0x288   :  { %v2242_v0 = vpop.f32.mrf.mxu0  ;;  %v1240_v3 = vadd.f32 %v2228_v60, %v1139_v61 }
 0x289   :  { %v1231_v63 = vpop.f32.mrf.mxu1 }
 0x28a   :  { %v1232_v6 = vadd.f32 %v1231_v63, %v1132_v1  ;;  %v1334_v8 = vpop.f32.mrf.mxu0  ;;  %v1341_v10 = vadd.f32 %v2242_v0, %v1240_v3 }
 0x28b   :  { %v2253_v4 = vpop.f32.mrf.mxu1 }
 0x28c   :  { %v1422_v7 = vadd.f32 %v2253_v4, %v1329_v2  ;;  %v1335_v14 = vadd.f32 %v1334_v8, %v1232_v6 }
 0x28d   :  { %v1415_v9 = vpop.f32.mrf.mxu1 }
 0x28e   :  { %2351 = vtanh.f32 %v1422_v7  ;;  %v1416_v11 = vadd.f32 %v1415_v9, %v1323_v5 }
 0x28f   :  { %v2256_v12 = vpop.f32.mrf.mxu1 }
 0x290   :  { %2353 = vtanh.f32 %v1416_v11  ;;  %v1434_v15 = vadd.f32 %v2256_v12, %v1341_v10 }
 0x291   :  { %v1427_v16 = vpop.f32.mrf.mxu1 }
 0x292   :  { %2355 = vtanh.f32 %v1434_v15  ;;  %v1428_v17 = vadd.f32 %v1427_v16, %v1335_v14 }
 0x294   :  { %2357 = vtanh.f32 %v1428_v17 }
 0x29b   :  { %v2352_v24 = vpop.eup %2351 }
 0x29c   :  { %v2725_v25 = vand.u32 4294901760, %v2352_v24 }
 0x29d   :  { %v2354_v26 = vpop.eup %2353 }
 0x29e   :  { %v2728_v29 = vand.u32 4294901760, %v2354_v26  ;;  %v1574_v30 = vsub.f32 %v2352_v24, %v2725_v25 }
 0x29f   :  { %v2356_v48 = vpop.eup %2355 }
 0x2a0   :  { %v2730_v19 = vand.u32 4294901760, %v2356_v48  ;;  %v1581_v36 = vsub.f32 %v2354_v26, %v2728_v29  ;;  %v1575_v39 = vand.u32 4294901760, %v1574_v30 }
 0x2a1   :  { %v2358_v31 = vpop.eup %2357 }
 0x2a2   :  { %2258 = vmatpush3.msra.mxu0 %v2730_v19  ;;  %v2737_v34 = vand.u32 4294901760, %v2358_v31  ;;  %v1560_v35 = vsub.f32 %v2356_v48, %v2730_v19  ;;  %v1582_v43 = vand.u32 4294901760, %v1581_v36  ;;  %v1576_v46 = vsub.f32 %v1574_v30, %v1575_v39 }
 0x2a3   :  { %2259 = vmatprep.subr.mxu0 %v2383_v49 }
 0x2a4   :  { %2260 = vmatpush3.msra.mxu0 %v2737_v34  ;;  %v1561_v37 = vand.u32 4294901760, %v1560_v35  ;;  %v1567_v38 = vsub.f32 %v2358_v31, %v2737_v34  ;;  %v1583_v21 = vsub.f32 %v1581_v36, %v1582_v43  ;;  %v1577_v23 = vand.u32 4294901760, %v1576_v46 }
 0x2a5   :  { %2261 = vmatprep.subr.mxu0 %v2383_v49 }
 0x2a6   :  { %2262 = vmatpush3.msra.mxu0 %v2725_v25  ;;  %v1562_v41 = vsub.f32 %v1560_v35, %v1561_v37  ;;  %v1568_v42 = vand.u32 4294901760, %v1567_v38  ;;  %v1584_v50 = vand.u32 4294901760, %v1583_v21 }
 0x2a7   :  { %2263 = vmatprep.subr.mxu0 %v2383_v49 }
 0x2a8   :  { %2264 = vmatpush3.msra.mxu0 %v2728_v29  ;;  %v1563_v44 = vand.u32 4294901760, %v1562_v41  ;;  %v1569_v45 = vsub.f32 %v1567_v38, %v1568_v42 }
 0x2a9   :  { %2266 = vmatmul.mubr.f32.vlgmr.msra.gmra.mxu0 %v1528_v40  ;;  %2279 = vmatprep.subr.mxu0 %v2383_v49 }
 0x2aa   :  { %2269 = vmatpush3.msra.mxu1 %v1563_v44  ;;  %2280 = vmatpush3.msra.mxu0 %v1560_v35  ;;  %v1570_v47 = vand.u32 4294901760, %v1569_v45 }
 0x2ab   :  { %2270 = vmatprep.subr.mxu1 %v2383_v49  ;;  %2281 = vmatprep.subr.mxu0 %v2383_v49 }
 0x2ac   :  { %2271 = vmatpush3.msra.mxu1 %v1570_v47  ;;  %2282 = vmatpush3.msra.mxu0 %v1567_v38 }
 0x2ad   :  { %2272 = vmatprep.subr.mxu1 %v2383_v49  ;;  %2283 = vmatprep.subr.mxu0 %v2383_v49 }
 0x2ae   :  { %2273 = vmatpush3.msra.mxu1 %v1577_v23  ;;  %2284 = vmatpush3.msra.mxu0 %v1574_v30 }
 0x2af   :  { %2274 = vmatprep.subr.mxu1 %v2383_v49  ;;  %2285 = vmatprep.subr.mxu0 %v2383_v49 }
 0x2b0   :  { %2275 = vmatpush3.msra.mxu1 %v1584_v50  ;;  %2286 = vmatpush3.msra.mxu0 %v1581_v36 }
 0x2b1   :  { %2277 = vmatmul.mubr.f32.vlgmr.msra.gmra.mxu1 %v2720_v20  ;;  %2287 = vmatprep.mubr.msk.f32.mxu0 %vm2384_vm1, %v2383_v49 }
 0x2b2   :  { %2290 = vmatprep.subr.mxu1 %v2383_v49  ;;  %2301 = vmatprep.subr.mxu0 %v2383_v49 }
 0x2b3   :  { %2288 = vmatmul.mubr.f32.vlgmr.msra.gmra.mxu0 %v2723_v22  ;;  %2291 = vmatpush3.msra.mxu1 %v2730_v19 }
 0x2b4   :  { %2302 = vmatpush3.msra.mxu0 %v1561_v37  ;;  %2292 = vmatprep.subr.mxu1 %v2383_v49 }
 0x2b5   :  { %2303 = vmatprep.subr.mxu0 %v2383_v49  ;;  %2293 = vmatpush3.msra.mxu1 %v2737_v34 }
 0x2b6   :  { %2304 = vmatpush3.msra.mxu0 %v1568_v42  ;;  %2294 = vmatprep.subr.mxu1 %v2383_v49 }
 0x2b7   :  { %2305 = vmatprep.subr.mxu0 %v2383_v49  ;;  %2295 = vmatpush3.msra.mxu1 %v2725_v25 }
 0x2b8   :  { %2306 = vmatpush3.msra.mxu0 %v1575_v39  ;;  %2296 = vmatprep.subr.mxu1 %v2383_v49 }
 0x2b9   :  { %2307 = vmatprep.subr.mxu0 %v2383_v49  ;;  %2297 = vmatpush3.msra.mxu1 %v2728_v29 }
 0x2ba   :  { %2298 = vmatprep.mubr.msk.f32.mxu1 %vm2384_vm1, %v2383_v49  ;;  %2308 = vmatpush3.msra.mxu0 %v1582_v43 }
 0x2bb   :  { %2299 = vmatmul.mubr.f32.vlgmr.msra.gmra.mxu1 %v1526_v27  ;;  %2312 = vmatprep.subr.mxu1 %v2383_v49 }
 0x2bc   :  { %2309 = vmatprep.mubr.msk.f32.mxu0 %vm2384_vm1, %v2383_v49  ;;  %2313 = vmatpush3.msra.mxu1 %v2730_v19 }
 0x2bd   :  { %2310 = vmatmul.mubr.f32.vlgmr.msra.gmra.mxu0 %v2720_v20  ;;  %2314 = vmatprep.subr.mxu1 %v2383_v49 }
 0x2be   :  { %2315 = vmatpush3.msra.mxu1 %v2737_v34  ;;  %2320 = vmatprep.mubr.msk.f32.mxu1 %vm2384_vm1, %v2383_v49 }
 0x2bf   :  { %2316 = vmatprep.subr.mxu1 %v2383_v49 }
 0x2c0   :  { %2317 = vmatpush3.msra.mxu1 %v2725_v25 }
 0x2c1   :  { %2318 = vmatprep.subr.mxu1 %v2383_v49 }
 0x2c2   :  { %2319 = vmatpush3.msra.mxu1 %v2728_v29 }
 0x2c3   :  { %2321 = vmatmul.mubr.f32.vlgmr.msra.gmra.mxu1 %v2720_v20 }
 0x369   :  { %v1530_v51 = vpop.f32.mrf.mxu0 }
 0x36a   :  { %v1531_v59 = vadd.f32 %v1530_v51, %v1451_v57 }
 0x36b   :  { %v2267_v52 = vpop.f32.mrf.mxu0 }
 0x371   :  { %v1621_v54 = vpop.f32.mrf.mxu1 }
 0x372   :  { %v1622_v60 = vadd.f32 %v1621_v54, %v1531_v59 }
 0x373   :  { %v2278_v55 = vpop.f32.mrf.mxu1  ;;  %v1701_v56 = vpop.f32.mrf.mxu0 }
 0x374   :  { %v1702_v62 = vadd.f32 %v1701_v56, %v1622_v60 }
 0x375   :  { %v2289_v58 = vpop.f32.mrf.mxu0 }
 0x37b   :  { %v1778_v61 = vpop.f32.mrf.mxu1 }
 0x37c   :  { %v1779_v0 = vadd.f32 %v1778_v61, %v1702_v62 }
 0x37d   :  { %v2300_v63 = vpop.f32.mrf.mxu1  ;;  %v1861_v49 = vpop.f32.mrf.mxu0 }
 0x37e   :  { %v1862_v2 = vadd.f32 %v1861_v49, %v1779_v0 }
 0x37f   :  { %v2311_v1 = vpop.f32.mrf.mxu0 }
 0x383   :  { %v1936_v3 = vpop.f32.mrf.mxu1 }
 0x384   :  { %v1937_v4 = vadd.f32 %v1936_v3, %v1862_v2 }
 0x385   :  { %v2322_v5 = vpop.f32.mrf.mxu1 }
 0x386   :  { %1940 = vst [vmem:[#allocation3] sm:$0x1] %v1937_v4 }
 0x387   :  { %2370 = shalt.err (!%p2367_p4)
}
 0x388   :  { %1950 = dma.vmem_to_hbm [thread:$0]  %s1948_s24, 16, %s2801_s7, [#allocation4]  }
 0x389   :  { %2379 = dma.done.wait [#allocation4], 16  }
 0x38a   :  { %2380 = vsyncadd [#allocation4], 4294967280 }
 0x38b   :  { %1954 = vsyncpa [#allocation4], 1 }

</bundles_post_ra>
